<compile_context>
chip_gen: v5e
topology: v5e:2x2
jax: 0.10.0
libtpu: 0.0.40
codegen_flags: <defaults>
</compile_context>

<pallas_src>
import jax
import jax.numpy as jnp
from jax.experimental import pallas as pl
from jax.experimental.pallas import tpu as pltpu


def _round_up(x: int, m: int) -> int:
    return ((x + m - 1) // m) * m


def encoder_kernel(x_ref, w1_ref, b1_ref, w2_ref, b2_ref, w3_ref, b3_ref, out_ref):
    # Layer 1: bf16 matmul on the MXU, f32 accumulate; bias + ReLU in f32 on the VPU.
    h = jnp.dot(x_ref[...], w1_ref[...], preferred_element_type=jnp.float32) + b1_ref[...]
    h = jnp.maximum(h, 0.0)
    # Layer 2.
    h = jnp.dot(h.astype(w2_ref.dtype), w2_ref[...],
                preferred_element_type=jnp.float32) + b2_ref[...]
    h = jnp.maximum(h, 0.0)
    # Layer 3 (final): linear only, no activation. Lane-dense (padded-to-128) output slab.
    out_ref[...] = (
        jnp.dot(h.astype(w3_ref.dtype), w3_ref[...], preferred_element_type=jnp.float32)
        + b3_ref[...]
    ).astype(out_ref.dtype)


def encoder_forward(x, params, *, tile_m: int = 256, compute_dtype=jnp.bfloat16):
    """x: [batch, input_dim] f32; params: list of (W[in,out], b[1,out]) for 3 layers.

    Weights are stored as [in, out] (transpose of torch.nn.Linear.weight) so the kernel
    computes y = x @ W + b directly without in-kernel transposes.
    """
    (w1, b1), (w2, b2), (w3, b3) = params
    batch, input_dim = x.shape
    h1 = w1.shape[1]
    h2 = w2.shape[1]
    latent_dim = w3.shape[1]

    # Lane-dense padding for the feature axes (last dim -> multiple of 128).
    in_pad = _round_up(input_dim, 128)
    lat_pad = _round_up(latent_dim, 128)

    # Batch tile: multiple of 8 sublanes, capped at tile_m; pad batch to a whole number of
    # tiles so the last grid step never reads/writes out-of-range rows (OOB is unchecked).
    tm = min(tile_m, _round_up(batch, 8))
    batch_pad = _round_up(batch, tm)

    xp = jnp.pad(x, ((0, batch_pad - batch), (0, in_pad - input_dim))).astype(compute_dtype)
    w1p = jnp.pad(w1, ((0, in_pad - input_dim), (0, 0))).astype(compute_dtype)
    w2p = w2.astype(compute_dtype)
    w3p = jnp.pad(w3, ((0, 0), (0, lat_pad - latent_dim))).astype(compute_dtype)
    b1p = b1.astype(jnp.float32)
    b2p = b2.astype(jnp.float32)
    b3p = jnp.pad(b3, ((0, 0), (0, lat_pad - latent_dim))).astype(jnp.float32)

    grid = (batch_pad // tm,)

    act_bytes = jnp.dtype(compute_dtype).itemsize
    flops = 2 * batch_pad * (in_pad * h1 + h1 * h2 + h2 * lat_pad)
    bytes_accessed = (
        xp.size * act_bytes
        + (w1p.size + w2p.size + w3p.size) * act_bytes
        + (b1p.size + b2p.size + b3p.size) * 4
        + batch_pad * lat_pad * 4
    )

    out = pl.pallas_call(
        encoder_kernel,
        out_shape=jax.ShapeDtypeStruct((batch_pad, lat_pad), jnp.float32),
        grid=grid,
        in_specs=[
            pl.BlockSpec((tm, in_pad), lambda i: (i, 0)),      # x tile streams over batch
            pl.BlockSpec((in_pad, h1), lambda i: (0, 0)),      # weights stay resident
            pl.BlockSpec((1, h1), lambda i: (0, 0)),
            pl.BlockSpec((h1, h2), lambda i: (0, 0)),
            pl.BlockSpec((1, h2), lambda i: (0, 0)),
            pl.BlockSpec((h2, lat_pad), lambda i: (0, 0)),
            pl.BlockSpec((1, lat_pad), lambda i: (0, 0)),
        ],
        out_specs=pl.BlockSpec((tm, lat_pad), lambda i: (i, 0)),
        compiler_params=pltpu.CompilerParams(
            dimension_semantics=("parallel",),
        ),
        cost_estimate=pl.CostEstimate(
            flops=flops, transcendentals=0, bytes_accessed=bytes_accessed
        ),
    )(xp, w1p, b1p, w2p, b2p, w3p, b3p)

    # Strip batch / lane padding.
    return out[:batch, :latent_dim]


def init_params(key, input_dim, latent_dim, hidden_sizes=(256, 128)):
    """Deterministic synthetic init (PyTorch-Linear-style uniform bounds), stored f32."""
    sizes = [input_dim] + list(hidden_sizes) + [latent_dim]
    params = []
    for i in range(1, len(sizes)):
        fan_in, fan_out = sizes[i - 1], sizes[i]
        key, kw, kb = jax.random.split(key, 3)
        bound = 1.0 / (fan_in ** 0.5)
        # Stored as [in, out] == transpose of torch.nn.Linear.weight.
        w = jax.random.uniform(kw, (fan_in, fan_out), jnp.float32, -bound, bound)
        b = jax.random.uniform(kb, (1, fan_out), jnp.float32, -bound, bound)
        params.append((w, b))
    return params


def encoder_reference(x, params, compute_dtype=jnp.bfloat16):
    """Pure-JAX reference mirroring the kernel's dtype handling exactly."""
    h = x.astype(compute_dtype)
    for (w, b) in params[:-1]:
        h = jnp.maximum(
            jnp.dot(h, w.astype(compute_dtype), preferred_element_type=jnp.float32)
            + b.astype(jnp.float32),
            0.0,
        ).astype(compute_dtype)
    w, b = params[-1]
    return (
        jnp.dot(h, w.astype(compute_dtype), preferred_element_type=jnp.float32)
        + b.astype(jnp.float32)
    )


if __name__ == "__main__":
    key = jax.random.PRNGKey(0)
    batch, input_dim, latent_dim = 8, 32, 16

    kx, kp = jax.random.split(key)
    x = jax.random.normal(kx, (batch, input_dim), jnp.float32)
    params = init_params(kp, input_dim, latent_dim, hidden_sizes=(256, 128))

    latent = encoder_forward(x, params)
    latent = jax.block_until_ready(latent)

    ref = encoder_reference(x, params)
    assert latent.shape == (batch, latent_dim)
    assert jnp.allclose(latent, ref, atol=1e-2, rtol=1e-2), "mismatch vs reference"

    print("KERNEL_OK")
</pallas_src>

<mosaic_0001>
module attributes {stable_mosaic.version = 11 : i64} {
  func.func @encoder_kernel(%arg0: i32, %arg1: memref<8x128xbf16, #tpu.memory_space<vmem>>, %arg2: memref<128x256xbf16, #tpu.memory_space<vmem>>, %arg3: memref<1x256xf32, #tpu.memory_space<vmem>>, %arg4: memref<256x128xbf16, #tpu.memory_space<vmem>>, %arg5: memref<1x128xf32, #tpu.memory_space<vmem>>, %arg6: memref<128x128xbf16, #tpu.memory_space<vmem>>, %arg7: memref<1x128xf32, #tpu.memory_space<vmem>>, %arg8: memref<8x128xf32, #tpu.memory_space<vmem>>) attributes {dimension_semantics = [#tpu.dimension_semantics<parallel>], iteration_bounds = array<i64: 1>, scalar_prefetch = 0 : i64, scratch_operands = 0 : i64, tpu.core_type = #tpu.core_type<tc>, window_params = [{transform_indices = @transform_0, window_bounds = array<i64: 8, 128>}, {pipeline_mode = #tpu.pipeline_mode<synchronous>, transform_indices = @transform_1, window_bounds = array<i64: 128, 256>}, {pipeline_mode = #tpu.pipeline_mode<synchronous>, transform_indices = @transform_2, window_bounds = array<i64: 1, 256>}, {pipeline_mode = #tpu.pipeline_mode<synchronous>, transform_indices = @transform_3, window_bounds = array<i64: 256, 128>}, {pipeline_mode = #tpu.pipeline_mode<synchronous>, transform_indices = @transform_4, window_bounds = array<i64: 1, 128>}, {pipeline_mode = #tpu.pipeline_mode<synchronous>, transform_indices = @transform_5, window_bounds = array<i64: 128, 128>}, {pipeline_mode = #tpu.pipeline_mode<synchronous>, transform_indices = @transform_6, window_bounds = array<i64: 1, 128>}, {transform_indices = @transform_7, window_bounds = array<i64: 8, 128>}]} {
    %c0 = arith.constant 0 : index
    %c0_0 = arith.constant 0 : index
    %0 = vector.load %arg1[%c0, %c0_0] : memref<8x128xbf16, #tpu.memory_space<vmem>>, vector<8x128xbf16>
    %c0_1 = arith.constant 0 : index
    %c0_2 = arith.constant 0 : index
    %1 = vector.load %arg2[%c0_1, %c0_2] : memref<128x256xbf16, #tpu.memory_space<vmem>>, vector<128x256xbf16>
    %cst = arith.constant dense<0.000000e+00> : vector<8x256xf32>
    %2 = tpu.matmul %0, %1, %cst {dimension_numbers = #tpu.dot_dimension_numbers<[1], [0], [0], [1], [0, 0, 1, 1], [], []>} : vector<8x128xbf16>, vector<128x256xbf16>, vector<8x256xf32> -> vector<8x256xf32>
    %c0_3 = arith.constant 0 : index
    %c0_4 = arith.constant 0 : index
    %3 = vector.load %arg3[%c0_3, %c0_4] : memref<1x256xf32, #tpu.memory_space<vmem>>, vector<1x256xf32>
    %4 = vector.broadcast %3 : vector<1x256xf32> to vector<8x256xf32>
    %5 = arith.addf %2, %4 : vector<8x256xf32>
    %cst_5 = arith.constant 0.000000e+00 : f32
    %6 = vector.broadcast %cst_5 : f32 to vector<8x256xf32>
    %7 = arith.maximumf %5, %6 : vector<8x256xf32>
    %8 = arith.truncf %7 : vector<8x256xf32> to vector<8x256xbf16>
    %c0_6 = arith.constant 0 : index
    %c0_7 = arith.constant 0 : index
    %9 = vector.load %arg4[%c0_6, %c0_7] : memref<256x128xbf16, #tpu.memory_space<vmem>>, vector<256x128xbf16>
    %cst_8 = arith.constant dense<0.000000e+00> : vector<8x128xf32>
    %10 = tpu.matmul %8, %9, %cst_8 {dimension_numbers = #tpu.dot_dimension_numbers<[1], [0], [0], [1], [0, 0, 1, 1], [], []>} : vector<8x256xbf16>, vector<256x128xbf16>, vector<8x128xf32> -> vector<8x128xf32>
    %c0_9 = arith.constant 0 : index
    %c0_10 = arith.constant 0 : index
    %11 = vector.load %arg5[%c0_9, %c0_10] : memref<1x128xf32, #tpu.memory_space<vmem>>, vector<1x128xf32>
    %12 = vector.broadcast %11 : vector<1x128xf32> to vector<8x128xf32>
    %13 = arith.addf %10, %12 : vector<8x128xf32>
    %cst_11 = arith.constant 0.000000e+00 : f32
    %14 = vector.broadcast %cst_11 : f32 to vector<8x128xf32>
    %15 = arith.maximumf %13, %14 : vector<8x128xf32>
    %16 = arith.truncf %15 : vector<8x128xf32> to vector<8x128xbf16>
    %c0_12 = arith.constant 0 : index
    %c0_13 = arith.constant 0 : index
    %17 = vector.load %arg6[%c0_12, %c0_13] : memref<128x128xbf16, #tpu.memory_space<vmem>>, vector<128x128xbf16>
    %cst_14 = arith.constant dense<0.000000e+00> : vector<8x128xf32>
    %18 = tpu.matmul %16, %17, %cst_14 {dimension_numbers = #tpu.dot_dimension_numbers<[1], [0], [0], [1], [0, 0, 1, 1], [], []>} : vector<8x128xbf16>, vector<128x128xbf16>, vector<8x128xf32> -> vector<8x128xf32>
    %c0_15 = arith.constant 0 : index
    %c0_16 = arith.constant 0 : index
    %19 = vector.load %arg7[%c0_15, %c0_16] : memref<1x128xf32, #tpu.memory_space<vmem>>, vector<1x128xf32>
    %20 = vector.broadcast %19 : vector<1x128xf32> to vector<8x128xf32>
    %21 = arith.addf %18, %20 : vector<8x128xf32>
    %c0_17 = arith.constant 0 : index
    %c0_18 = arith.constant 0 : index
    %22 = vector.load %arg8[%c0_17, %c0_18] : memref<8x128xf32, #tpu.memory_space<vmem>>, vector<8x128xf32>
    tpu.vector_store %arg8[%c0_17, %c0_18], %21 {strides = array<i32>} : memref<8x128xf32, #tpu.memory_space<vmem>>, vector<8x128xf32>,
    return
  }
  func.func @transform_0(%arg0: i32) -> (i32, i32) {
    %c0_i32 = arith.constant 0 : i32
    %c0_i32_0 = arith.constant 0 : i32
    return %arg0, %c0_i32 : i32, i32
  }
  func.func @transform_1(%arg0: i32) -> (i32, i32) {
    %c0_i32 = arith.constant 0 : i32
    %c0_i32_0 = arith.constant 0 : i32
    %c0_i32_1 = arith.constant 0 : i32
    return %c0_i32, %c0_i32_0 : i32, i32
  }
  func.func @transform_2(%arg0: i32) -> (i32, i32) {
    %c0_i32 = arith.constant 0 : i32
    %c0_i32_0 = arith.constant 0 : i32
    %c0_i32_1 = arith.constant 0 : i32
    return %c0_i32, %c0_i32_0 : i32, i32
  }
  func.func @transform_3(%arg0: i32) -> (i32, i32) {
    %c0_i32 = arith.constant 0 : i32
    %c0_i32_0 = arith.constant 0 : i32
    %c0_i32_1 = arith.constant 0 : i32
    return %c0_i32, %c0_i32_0 : i32, i32
  }
  func.func @transform_4(%arg0: i32) -> (i32, i32) {
    %c0_i32 = arith.constant 0 : i32
    %c0_i32_0 = arith.constant 0 : i32
    %c0_i32_1 = arith.constant 0 : i32
    return %c0_i32, %c0_i32_0 : i32, i32
  }
  func.func @transform_5(%arg0: i32) -> (i32, i32) {
    %c0_i32 = arith.constant 0 : i32
    %c0_i32_0 = arith.constant 0 : i32
    %c0_i32_1 = arith.constant 0 : i32
    return %c0_i32, %c0_i32_0 : i32, i32
  }
  func.func @transform_6(%arg0: i32) -> (i32, i32) {
    %c0_i32 = arith.constant 0 : i32
    %c0_i32_0 = arith.constant 0 : i32
    %c0_i32_1 = arith.constant 0 : i32
    return %c0_i32, %c0_i32_0 : i32, i32
  }
  func.func @transform_7(%arg0: i32) -> (i32, i32) {
    %c0_i32 = arith.constant 0 : i32
    %c0_i32_0 = arith.constant 0 : i32
    return %arg0, %c0_i32 : i32, i32
  }
}

</mosaic_0001>

<bundles_post_ra>
// kernel: tpu_custom_call.1
= control target key start
LH: loop header
LB: loop body
LE: loop exit
PB: predicated region body
PF: predicated region fallthrough
CT: control target
= control target key end

     0   :  { %12 = vsyncpa [#allocation3], 0  ;;  %s933_s0 = inlined_call_operand.hbm [shape: bf16[8,128], index: 0, kind: input, shape index: {}]   ;;  %s934_s1 = inlined_call_operand.hbm [shape: bf16[128,256], index: 1, kind: input, shape index: {}]   ;;  %s935_s2 = inlined_call_operand.hbm [shape: f32[1,256], index: 2, kind: input, shape index: {}]   ;;  %s936_s3 = inlined_call_operand.hbm [shape: bf16[256,128], index: 3, kind: input, shape index: {}]   ;;  %s937_s4 = inlined_call_operand.vmem [shape: f32[1,128], index: 4, kind: input, shape index: {}]   ;;  %s938_s5 = inlined_call_operand.hbm [shape: bf16[128,128], index: 5, kind: input, shape index: {}]   ;;  %s939_s6 = inlined_call_operand.vmem [shape: f32[1,128], index: 6, kind: input, shape index: {}]   ;;  %s940_s7 = inlined_call_operand.hbm [shape: f32[8,128], index: 7, kind: output, shape index: {}]  }
   0x1   :  { %13 = vsyncpa [#allocation6], 0 }
   0x2   :  { %14 = vsyncpa [#allocation9], 0  ;;  %s31_s26 = sshll.u32 %s934_s1, 4  ;;  %s32_s26 = int_to_ptr.hbm [resolvable:$true] %s31_s26 }
   0x3   :  { %15 = vsyncpa [#allocation4], 0  ;;  %s859_s27 = smov [#allocation5]   ;;  %s55_s8 = sshll.u32 %s936_s3, 4  ;;  %s56_s8 = int_to_ptr.hbm [resolvable:$true] %s55_s8 }
   0x4   :  { %s33_s28 = sshll.u32 %s859_s27, 4  ;;  %s860_s9 = smov 128   ;;  %s34_s28 = int_to_ptr.vmem [resolvable:$true] %s33_s28 }
   0x5   :  { %s861_s10 = smov 8   ;;  %s862_s11 = smov [#allocation8]  }
   0x6   :  { %39 = dma.hbm_to_vmem [thread:$0]  %s32_s26, 2048, %s34_s28, [#allocation6], %s860_s9, %s860_s9, %s861_s10  }
   0x7   :  { %s57_s12 = sshll.u32 %s862_s11, 4  ;;  %s863_s13 = smov 64   ;;  %s58_s12 = int_to_ptr.vmem [resolvable:$true] %s57_s12 }
   0x8   :  { %s864_s14 = smov 4   ;;  %s21_s16 = sshll.u32 %s933_s0, 4  ;;  %s22_s16 = int_to_ptr.hbm [resolvable:$true] %s21_s16 }
   0x9   :  { %63 = dma.hbm_to_vmem [thread:$0]  %s56_s8, 2048, %s58_s12, [#allocation9], %s863_s13, %s863_s13, %s864_s14  }
   0xa   :  { %s865_s17 = smov [#allocation2]   ;;  %s45_s20 = sshll.u32 %s935_s2, 4  ;;  %s46_s20 = int_to_ptr.hbm [resolvable:$true] %s45_s20 }
   0xb   :  { %s23_s18 = sshll.u32 %s865_s17, 4  ;;  %s866_s21 = smov [#allocation7]   ;;  %s24_s18 = int_to_ptr.vmem [resolvable:$true] %s23_s18 }
   0xc   :  { %26 = dma.hbm_to_vmem [thread:$0]  %s22_s16, 64, %s24_s18, [#allocation3]  }
   0xd   :  { %s47_s22 = sshll.u32 %s866_s21, 4  ;;  %s70_s25 = sshll.u32 %s938_s5, 4  ;;  %s48_s22 = int_to_ptr.vmem [resolvable:$true] %s47_s22  ;;  %s71_s25 = int_to_ptr.hbm [resolvable:$true] %s70_s25 }
   0xe   :  { %50 = dma.hbm_to_vmem [thread:$0]  %s46_s20, 32, %s48_s22, [#allocation6]  }
   0xf   :  { %s867_s0 = smov [#allocation10]  }
  0x10   :  { %s72_s26 = sshll.u32 %s867_s0, 4  ;;  %s73_s26 = int_to_ptr.vmem [resolvable:$true] %s72_s26 }
  0x11   :  { %78 = dma.hbm_to_vmem [thread:$0]  %s71_s25, 1024, %s73_s26, [#allocation9], %s863_s13, %s863_s13, %s864_s14  }
  0x12   :  { %851 = dma.done.wait [#allocation3], 64  }
  0x13   :  { %852 = vsyncadd [#allocation3], 4294967232 }
  0x14   :  { %853 = dma.done.wait [#allocation6], 2080  }
  0x15   :  { %854 = vsyncadd [#allocation6], 4294965216 }
  0x16   :  { %855 = dma.done.wait [#allocation9], 3072  }
  0x17   :  { %856 = vsyncadd [#allocation9], 4294964224  ;;  %v553_v0 = vld [vmem:[#allocation5 + $0x70] sm:$0xf]  ;;  %v670_v1 = vld [vmem:[#allocation5 + $0x74] sm:$0xf0] }
  0x18   :  { %v669_v2 = vld [vmem:[#allocation5 + $0x74] sm:$0xf]  ;;  %v554_v3 = vor.u32 %v670_v1, %v553_v0  ;;  %v555_v4 = vld [vmem:[#allocation5 + $0x78] sm:$0xf0]  ;;  %v545_v5 = vld [vmem:[#allocation5 + $0x60] sm:$0xf] }
  0x19   :  { %v668_v6 = vld [vmem:[#allocation5 + $0x64] sm:$0xf0]  ;;  %v558_v7 = vor.u32 %v669_v2, %v555_v4  ;;  %v667_v8 = vld [vmem:[#allocation5 + $0x64] sm:$0xf]  ;;  %v547_v9 = vld [vmem:[#allocation5 + $0x68] sm:$0xf0] }
  0x1a   :  { %204 = vmatpush.bf16.msra.mxu0 %v554_v3  ;;  %v546_v10 = vor.u32 %v668_v6, %v545_v5  ;;  %v550_v11 = vor.u32 %v667_v8, %v547_v9  ;;  %v537_v12 = vld [vmem:[#allocation5 + $0x50] sm:$0xf]  ;;  %v666_v13 = vld [vmem:[#allocation5 + $0x54] sm:$0xf0]  ;;  %v665_v14 = vld [vmem:[#allocation5 + $0x54] sm:$0xf] }
  0x1b   :  { %217 = vmatpush.bf16.msra.mxu1 %v558_v7  ;;  %v539_v15 = vld [vmem:[#allocation5 + $0x58] sm:$0xf0]  ;;  %v538_v16 = vor.u32 %v666_v13, %v537_v12  ;;  %v529_v18 = vld [vmem:[#allocation5 + $0x40] sm:$0xf]  ;;  %v664_v19 = vld [vmem:[#allocation5 + $0x44] sm:$0xf0] }
  0x1c   :  { %v542_v17 = vor.u32 %v665_v14, %v539_v15  ;;  %v663_v20 = vld [vmem:[#allocation5 + $0x44] sm:$0xf]  ;;  %v531_v21 = vld [vmem:[#allocation5 + $0x48] sm:$0xf0]  ;;  %v530_v22 = vor.u32 %v664_v19, %v529_v18  ;;  %v678_v23 = vld [vmem:[#allocation8 + $0x38] sm:$0xff]  ;;  %s868_s29 = smov [#allocation11]  }
  0x1d   :  { %v686_v24 = vld [vmem:[#allocation8 + $0x78] sm:$0xff]  ;;  %v534_v25 = vor.u32 %v663_v20, %v531_v21  ;;  %v521_v26 = vld [vmem:[#allocation5 + $0x30] sm:$0xf]  ;;  %v661_v28 = vld [vmem:[#allocation5 + $0x34] sm:$0xf]  ;;  %366 = vmatpush.bf16.msra.mxu2 %v678_v23  ;;  %s481_s30 = sshll.u32 %s868_s29, 4  ;;  %s482_s30 = int_to_ptr.vmem [resolvable:$true] %s481_s30 }
  0x1e   :  { %205 = vmatpush.bf16.msra.mxu0 %v546_v10  ;;  %v662_v27 = vld [vmem:[#allocation5 + $0x34] sm:$0xf0]  ;;  %v523_v29 = vld [vmem:[#allocation5 + $0x38] sm:$0xf0]  ;;  %379 = vmatpush.bf16.msra.mxu3 %v686_v24  ;;  %v513_v34 = vld [vmem:[#allocation5 + $0x20] sm:$0xf] }
  0x1f   :  { %218 = vmatpush.bf16.msra.mxu1 %v550_v11  ;;  %v677_v30 = vld [vmem:[#allocation8 + $0x30] sm:$0xff]  ;;  %v522_v32 = vor.u32 %v662_v27, %v521_v26  ;;  %v526_v33 = vor.u32 %v661_v28, %v523_v29  ;;  %v660_v35 = vld [vmem:[#allocation5 + $0x24] sm:$0xf0]  ;;  %v659_v36 = vld [vmem:[#allocation5 + $0x24] sm:$0xf]  ;;  %s483_s10 = sshll.u32 %s940_s7, 4  ;;  %s484_s10 = int_to_ptr.hbm [resolvable:$true] %s483_s10 }
  0x20   :  { %v685_v31 = vld [vmem:[#allocation8 + $0x70] sm:$0xff]  ;;  %v515_v37 = vld [vmem:[#allocation5 + $0x28] sm:$0xf0]  ;;  %v514_v40 = vor.u32 %v660_v35, %v513_v34  ;;  %v507_v45 = vld [vmem:[#allocation5 + $0x18] sm:$0xf0] }
  0x21   :  { %367 = vmatpush.bf16.msra.mxu2 %v677_v30  ;;  %v676_v38 = vld [vmem:[#allocation8 + $0x28] sm:$0xff]  ;;  %v518_v41 = vor.u32 %v659_v36, %v515_v37  ;;  %v658_v43 = vld [vmem:[#allocation5 + $0x14] sm:$0xf0]  ;;  %v657_v44 = vld [vmem:[#allocation5 + $0x14] sm:$0xf] }
  0x22   :  { %206 = vmatpush.bf16.msra.mxu0 %v538_v16  ;;  %380 = vmatpush.bf16.msra.mxu3 %v685_v31  ;;  %v684_v39 = vld [vmem:[#allocation8 + $0x68] sm:$0xff]  ;;  %v675_v46 = vld [vmem:[#allocation8 + $0x20] sm:$0xff]  ;;  %v510_v49 = vor.u32 %v657_v44, %v507_v45  ;;  %v674_v54 = vld [vmem:[#allocation8 + $0x18] sm:$0xff] }
  0x23   :  { %219 = vmatpush.bf16.msra.mxu1 %v542_v17  ;;  %v505_v42 = vld [vmem:[#allocation5 + $0x10] sm:$0xf]  ;;  %v683_v47 = vld [vmem:[#allocation8 + $0x60] sm:$0xff]  ;;  %v499_v53 = vld [vmem:[#allocation5 + $0x8] sm:$0xf0] }
  0x24   :  { %v506_v48 = vor.u32 %v658_v43, %v505_v42  ;;  %v497_v50 = vld [vmem:[#allocation5] sm:$0xf]  ;;  %v656_v51 = vld [vmem:[#allocation5 + $0x4] sm:$0xf0]  ;;  %v655_v52 = vld [vmem:[#allocation5 + $0x4] sm:$0xf] }
  0x25   :  { %368 = vmatpush.bf16.msra.mxu2 %v676_v38  ;;  %v682_v55 = vld [vmem:[#allocation8 + $0x58] sm:$0xff]  ;;  %v498_v56 = vor.u32 %v656_v51, %v497_v50  ;;  %v502_v57 = vor.u32 %v655_v52, %v499_v53  ;;  %v673_v58 = vld [vmem:[#allocation8 + $0x10] sm:$0xff]  ;;  %v672_v61 = vld [vmem:[#allocation8 + $0x8] sm:$0xff] }
  0x26   :  { %207 = vmatpush.bf16.msra.mxu0 %v530_v22  ;;  %381 = vmatpush.bf16.msra.mxu3 %v684_v39  ;;  %v681_v59 = vld [vmem:[#allocation8 + $0x50] sm:$0xff]  ;;  %v101_v60 = vld [vmem:[#allocation2] sm:$0xf]  ;;  %v680_v62 = vld [vmem:[#allocation8 + $0x48] sm:$0xff] }
  0x27   :  { %220 = vmatpush.bf16.msra.mxu1 %v534_v25  ;;  %v671_v63 = vld [vmem:[#allocation8] sm:$0xff]  ;;  %v694_v1 = vld [vmem:[#allocation10 + $0x38] sm:$0xff]  ;;  %v693_v2 = vld [vmem:[#allocation10 + $0x30] sm:$0xff] }
  0x28   :  { %v679_v0 = vld [vmem:[#allocation8 + $0x40] sm:$0xff]  ;;  %v692_v3 = vld [vmem:[#allocation10 + $0x28] sm:$0xff]  ;;  %v690_v5 = vld [vmem:[#allocation10 + $0x18] sm:$0xff] }
  0x29   :  { %369 = vmatpush.bf16.msra.mxu2 %v675_v46  ;;  %v691_v4 = vld [vmem:[#allocation10 + $0x20] sm:$0xff]  ;;  %v118_v6 = vld [vmem:[#allocation7] sm:$0x3]  ;;  %v689_v7 = vld [vmem:[#allocation10 + $0x10] sm:$0xff] }
  0x2a   :  { %208 = vmatpush.bf16.msra.mxu0 %v522_v32  ;;  %382 = vmatpush.bf16.msra.mxu3 %v683_v47  ;;  %v120_v8 = vperm.slane %v118_v6, 0  ;;  %v121_v9 = vperm.slane %v118_v6, 1  ;;  %v688_v20 = vld [vmem:[#allocation10 + $0x8] sm:$0xff]  ;;  %v687_v21 = vld [vmem:[#allocation10] sm:$0xff]  ;;  %v705_v22 = vld [vmem:[%s937_s4] ss:$0 sm:$0xff] }
  0x2b   :  { %221 = vmatpush.bf16.msra.mxu1 %v526_v33  ;;  %v706_v31 = vld [vmem:[%s939_s6] ss:$0 sm:$0xff] }
  0x2d   :  { %370 = vmatpush.bf16.msra.mxu2 %v674_v54 }
  0x2e   :  { %209 = vmatpush.bf16.msra.mxu0 %v514_v40  ;;  %383 = vmatpush.bf16.msra.mxu3 %v682_v55 }
  0x2f   :  { %222 = vmatpush.bf16.msra.mxu1 %v518_v41 }
  0x31   :  { %371 = vmatpush.bf16.msra.mxu2 %v673_v58 }
  0x32   :  { %210 = vmatpush.bf16.msra.mxu0 %v506_v48  ;;  %384 = vmatpush.bf16.msra.mxu3 %v681_v59 }
  0x33   :  { %223 = vmatpush.bf16.msra.mxu1 %v510_v49 }
  0x35   :  { %372 = vmatpush.bf16.msra.mxu2 %v672_v61 }
  0x36   :  { %211 = vmatpush.bf16.msra.mxu0 %v498_v56  ;;  %385 = vmatpush.bf16.msra.mxu3 %v680_v62 }
  0x37   :  { %224 = vmatpush.bf16.msra.mxu1 %v502_v57 }
  0x39   :  { %212 = vmatmul.bf16.vlgmr.msra.gmra.mxu0 %v101_v60  ;;  %373 = vmatpush.bf16.msra.mxu2 %v671_v63 }
  0x3a   :  { %225 = vmatmul.bf16.vlgmr.msra.gmra.mxu1 %v101_v60  ;;  %386 = vmatpush.bf16.msra.mxu3 %v679_v0 }
  0x3b   :  { %462 = vmatpush.bf16.msrb.mxu0 %v694_v1 }
  0x3f   :  { %463 = vmatpush.bf16.msrb.mxu0 %v693_v2 }
  0x43   :  { %464 = vmatpush.bf16.msrb.mxu0 %v692_v3 }
  0x47   :  { %465 = vmatpush.bf16.msrb.mxu0 %v691_v4 }
  0x4b   :  { %466 = vmatpush.bf16.msrb.mxu0 %v690_v5 }
  0x4f   :  { %467 = vmatpush.bf16.msrb.mxu0 %v689_v7 }
  0x53   :  { %468 = vmatpush.bf16.msrb.mxu0 %v688_v20 }
  0x57   :  { %469 = vmatpush.bf16.msrb.mxu0 %v687_v21 }
  0xb6   :  { %v213_v10 = vpop.f32.mrf.mxu0 }
  0xb7   :  { %v214_v11 = vadd.f32 %v213_v10, %v120_v8  ;;  %v226_v12 = vpop.f32.mrf.mxu1 }
  0xb8   :  { %v227_v13 = vadd.f32 %v226_v12, %v121_v9 }
  0xb9   :  { %v230_v14 = vmax.f32 %v214_v11, 0.0 }
  0xba   :  { %v231_v15 = vmax.f32 %v227_v13, 0.0 }
  0xbb   :  { %v232_v16 = vpack.c.bf16 %v230_v14, %v230_v14 }
  0xbc   :  { %v233_v17 = vpack.c.bf16 %v231_v15, %v231_v15 }
  0xbd   :  { %374 = vmatmul.bf16.vlgmr.msra.gmra.mxu2 %v232_v16 }
  0xbe   :  { %387 = vmatmul.bf16.vlgmr.msra.gmra.mxu3 %v233_v17  ;;  %v215_v18 = vpop.f32.mrf.mxu0 }
  0xbf   :  { %v228_v19 = vpop.f32.mrf.mxu1 }
 0x140   :  { %v375_v23 = vpop.f32.mrf.mxu2 }
 0x141   :  { %v376_v24 = vadd.f32 %v705_v22, %v375_v23  ;;  %v388_v25 = vpop.f32.mrf.mxu3 }
 0x143   :  { %v389_v26 = vadd.f32 %v388_v25, %v376_v24 }
 0x145   :  { %v392_v27 = vmax.f32 %v389_v26, 0.0 }
 0x147   :  { %v393_v28 = vpack.c.bf16 %v392_v27, %v392_v27 }
 0x148   :  { %v377_v29 = vpop.f32.mrf.mxu2 }
 0x149   :  { %v390_v30 = vpop.f32.mrf.mxu3  ;;  %470 = vmatmul.bf16.vlgmr.msrb.gmra.mxu0 %v393_v28 }
 0x1c6   :  { %v471_v32 = vpop.f32.mrf.mxu0 }
 0x1c7   :  { %v472_v33 = vadd.f32 %v706_v31, %v471_v32 }
 0x1c9   :  { %475 = vst [vmem:[#allocation11] sm:$0xff] %v472_v33 }
 0x1ca   :  { %486 = dma.vmem_to_hbm [thread:$0]  %s482_s30, 128, %s484_s10, [#allocation4]  }
 0x1ce   :  { %v473_v34 = vpop.f32.mrf.mxu0 }
 0x1cf   :  { %857 = dma.done.wait [#allocation4], 128  }
 0x1d0   :  { %858 = vsyncadd [#allocation4], 4294967168 }
 0x1d1   :  { %491 = vsyncpa [#allocation3], 1 }
 0x1d2   :  { %492 = vsyncpa [#allocation6], 1 }
 0x1d3   :  { %493 = vsyncpa [#allocation9], 1 }
 0x1d4   :  { %494 = vsyncpa [#allocation4], 1 }

</bundles_post_ra>
